<compile_context>
chip_gen: v5e
topology: v5e:2x2
jax: 0.10.0
libtpu: 0.0.40
codegen_flags: <defaults>
</compile_context>

<pallas_src>
import functools
from math import sqrt

import jax
import jax.numpy as jnp
from jax.experimental import pallas as pl
from jax.experimental.pallas import tpu as pltpu


def _round_up(n, m):
    return ((n + m - 1) // m) * m


def _residual_block_kernel(d, L, Lpad, C, tb, S,
                           x_ref, xagg_ref, nproj_ref,
                           wtap_ref, bcomb_ref, wout_ref, bout_ref,
                           res_ref, skip_ref, sbuf_ref):
    """One grid step = tb batch rows, folded into the lane axis.

    sbuf_ref (bf16, (2C, tb*S + 2d)) holds per row i a segment of width S:
        [ d zeros | (x+noise ; x_agg) over Lpad lanes | zeros ... ]
    so one (2C,2C)@(2C, tb*S) MXU matmul per tap covers all rows at once
    (outputs landing in the inter-row gap lanes are garbage, never stored).
    """
    C2 = 2 * C
    Nout = tb * S
    inv_sqrt2 = 1.0 / sqrt(2.0)
    cdt = sbuf_ref.dtype                       # bf16 matmul-operand dtype

    # Zero only the halo lane-columns.  Done every step: with the batch axis
    # marked "parallel" each TensorCore has its own scratch instance, so this
    # must NOT be gated on program_id == 0.
    if d > 0:
        zd = jnp.zeros((C2, d), cdt)
        for i in range(tb):
            base = i * S
            sbuf_ref[:, base:base + d] = zd                          # left halo
            sbuf_ref[:, base + d + Lpad:base + 2 * d + Lpad] = zd    # right halo
        # tail lanes past the last segment (read by shifted taps, discarded)
        sbuf_ref[:, Nout:Nout + 2 * d] = jnp.zeros((C2, 2 * d), cdt)

    # noise_level must not leak into the zero padding beyond the true length L.
    if Lpad != L:
        lane = jax.lax.broadcasted_iota(jnp.int32, (1, Lpad), 1)
        vmask = (lane < L).astype(jnp.float32)                       # (1, Lpad)
    else:
        vmask = None

    # Write the tb rows into the stacked, padded scratch (cast to bf16 here).
    for i in range(tb):
        base = i * S
        nb = nproj_ref[i]                                            # (C, 1) f32
        nb = nb * vmask if vmask is not None else nb
        sbuf_ref[0:C, base + d:base + d + Lpad] = (x_ref[i] + nb).astype(cdt)
        sbuf_ref[C:C2, base + d:base + d + Lpad] = xagg_ref[i].astype(cdt)

    # Fused dilated_conv + agg_projection: ONE MXU matmul per tap over all
    # rows; f32 accumulator initialized from the fused conv biases.
    acc = jnp.broadcast_to(bcomb_ref[...], (C2, Nout))
    for k in range(3):
        acc = acc + jnp.dot(wtap_ref[k], sbuf_ref[:, k * d:k * d + Nout],
                            preferred_element_type=jnp.float32)

    # Gating in f32 (VPU/EUP), then the 1x1 output projection on the MXU.
    g = jax.nn.sigmoid(acc[:C]) * jnp.tanh(acc[C:])                  # (C, Nout)
    out = jnp.dot(wout_ref[...], g.astype(cdt),
                  preferred_element_type=jnp.float32) + bout_ref[...]

    # Residual / skip per row.  base = i*S and Lpad are multiples of 128, so
    # these slices and stores are lane-aligned and lane-dense.
    for i in range(tb):
        base = i * S
        res_ref[i] = ((x_ref[i] + out[:C, base:base + Lpad]) * inv_sqrt2
                      ).astype(res_ref.dtype)
        skip_ref[i] = out[C:, base:base + Lpad].astype(skip_ref.dtype)


def residual_block_pallas(x, x_agg, noise, params, dilation, *, tb=None):
    """x, x_agg: (B, C, L) float32 (PyTorch NCW); noise: (B, P)."""
    B, C, L = x.shape
    d = int(dilation)
    C2 = 2 * C
    Lpad = _round_up(L, 128)                # lane-dense outputs (unmasked vst)
    S = _round_up(Lpad + 2 * d, 128)        # per-row segment width in scratch

    if tb is None:
        # Largest divisor of B that is <= 8, preferring >= 2 grid steps so the
        # "parallel" batch axis can feed both TensorCores on v7x.
        divs = [t for t in range(min(B, 8), 0, -1) if B % t == 0]
        tb = next((t for t in divs if B // t >= 2), divs[0])

    pad = [(0, 0), (0, 0), (0, Lpad - L)]
    xf = x.astype(jnp.float32)
    xf = jnp.pad(xf, pad) if Lpad != L else xf                 # f32 (residual)
    xaggb = x_agg.astype(jnp.bfloat16)
    xaggb = jnp.pad(xaggb, pad) if Lpad != L else xaggb        # bf16 (matmul)

    # Diffusion Linear hoisted to one batched XLA matmul; only (B, C, 1)
    # enters the kernel.
    nproj = (noise.astype(jnp.float32) @ params["w_diff"].T.astype(jnp.float32)
             + params["b_diff"].astype(jnp.float32))[:, :, None]   # (B, C, 1)

    # Fuse dilated-conv + agg-conv weights per tap -> (3, 2C, 2C) bf16;
    # fuse the two conv biases (kept in f32).
    wtap = jnp.transpose(
        jnp.concatenate([params["w_dilated"], params["w_agg"]], axis=1),
        (2, 0, 1)).astype(jnp.bfloat16)                            # (3, 2C, 2C)
    bcomb = (params["b_dilated"] + params["b_agg"]).reshape(C2, 1).astype(jnp.float32)
    wout = params["w_out"][:, :, 0].astype(jnp.bfloat16)           # (2C, C)
    bout = params["b_out"].reshape(C2, 1).astype(jnp.float32)

    # Explicit VMEM budget: double-buffered IO tiles + weights + scratch.
    io_bytes = tb * C * Lpad * (4 + 2 + 2 * 4) + tb * C * 4
    w_bytes = 3 * C2 * C2 * 2 + C2 * C * 2 + 2 * C2 * 4
    scr_bytes = C2 * (tb * S + 2 * d) * 2
    need = 2 * io_bytes + w_bytes + scr_bytes
    vmem_limit = int(min(max(2 * need, 32 << 20), 64 << 20))

    kernel = functools.partial(_residual_block_kernel, d, L, Lpad, C, tb, S)
    res, skip = pl.pallas_call(
        kernel,
        out_shape=(jax.ShapeDtypeStruct((B, C, Lpad), jnp.float32),
                   jax.ShapeDtypeStruct((B, C, Lpad), jnp.float32)),
        grid_spec=pltpu.PrefetchScalarGridSpec(
            num_scalar_prefetch=0,
            grid=(B // tb,),
            in_specs=[
                pl.BlockSpec((tb, C, Lpad), lambda b: (b, 0, 0)),   # x (f32)
                pl.BlockSpec((tb, C, Lpad), lambda b: (b, 0, 0)),   # x_agg (bf16)
                pl.BlockSpec((tb, C, 1), lambda b: (b, 0, 0)),      # noise proj
                pl.BlockSpec((3, C2, C2), lambda b: (0, 0, 0)),     # fused tap W
                pl.BlockSpec((C2, 1), lambda b: (0, 0)),            # fused conv b
                pl.BlockSpec((C2, C), lambda b: (0, 0)),            # out-proj W
                pl.BlockSpec((C2, 1), lambda b: (0, 0)),            # out-proj b
            ],
            out_specs=(pl.BlockSpec((tb, C, Lpad), lambda b: (b, 0, 0)),
                       pl.BlockSpec((tb, C, Lpad), lambda b: (b, 0, 0))),
            scratch_shapes=[pltpu.VMEM((C2, tb * S + 2 * d), jnp.bfloat16)],
        ),
        compiler_params=pltpu.CompilerParams(
            dimension_semantics=("parallel",),
            vmem_limit_bytes=vmem_limit),
    )(xf, xaggb, nproj, wtap, bcomb, wout, bout)

    return res[:, :, :L], skip[:, :, :L]


# ---------------- pure-JAX reference (semantics check) ----------------
def _conv1d_ref(x, w, b, padding, dilation):
    out = jax.lax.conv_general_dilated(
        x, w, window_strides=(1,), padding=[(padding, padding)],
        rhs_dilation=(dilation,), dimension_numbers=("NCH", "OIH", "NCH"),
        precision=jax.lax.Precision.HIGHEST)
    return out + b[None, :, None]


def residual_block_ref(x, x_agg, noise, params, dilation):
    nproj = noise @ params["w_diff"].T + params["b_diff"]       # Linear
    y = x + nproj[:, :, None]
    y = _conv1d_ref(y, params["w_dilated"], params["b_dilated"], dilation, dilation)
    y = y + _conv1d_ref(x_agg, params["w_agg"], params["b_agg"], dilation, dilation)
    gate, filt = jnp.split(y, 2, axis=1)
    y = jax.nn.sigmoid(gate) * jnp.tanh(filt)
    y = _conv1d_ref(y, params["w_out"], params["b_out"], 0, 1)
    residual, skip = jnp.split(y, 2, axis=1)
    return (x + residual) / jnp.sqrt(2.0), skip


if __name__ == "__main__":
    B, C, L, P, dilation = 2, 4, 16, 8, 2   # residual_channels=4, pos_emb_dim=8

    key = jax.random.PRNGKey(0)
    ks = jax.random.split(key, 11)
    # deterministic synthetic init (kaiming-like scaling for conv weights)
    params = {
        "w_dilated": jax.random.normal(ks[0], (2 * C, C, 3), jnp.float32) * sqrt(2.0 / (C * 3)),
        "b_dilated": jax.random.normal(ks[1], (2 * C,), jnp.float32) * 0.1,
        "w_agg":     jax.random.normal(ks[2], (2 * C, C, 3), jnp.float32) * sqrt(2.0 / (C * 3)),
        "b_agg":     jax.random.normal(ks[3], (2 * C,), jnp.float32) * 0.1,
        "w_diff":    jax.random.normal(ks[4], (C, P), jnp.float32) * sqrt(1.0 / P),
        "b_diff":    jax.random.normal(ks[5], (C,), jnp.float32) * 0.1,
        "w_out":     jax.random.normal(ks[6], (2 * C, C, 1), jnp.float32) * sqrt(2.0 / C),
        "b_out":     jax.random.normal(ks[7], (2 * C,), jnp.float32) * 0.1,
    }
    x = jax.random.normal(ks[8], (B, C, L), jnp.float32)
    x_agg = jax.random.normal(ks[9], (B, C, L), jnp.float32)
    noise = jax.random.normal(ks[10], (B, P), jnp.float32)

    res, skip = residual_block_pallas(x, x_agg, noise, params, dilation)
    jax.block_until_ready((res, skip))

    res_ref, skip_ref = residual_block_ref(x, x_agg, noise, params, dilation)
    assert res.shape == (B, C, L) and skip.shape == (B, C, L)
    # Tolerance loosened vs a pure-f32 kernel: matmul operands are bf16
    # (accumulation and gating are f32), giving ~0.3-0.5% relative error.
    assert jnp.allclose(res, res_ref, rtol=2e-2, atol=2e-2)
    assert jnp.allclose(skip, skip_ref, rtol=2e-2, atol=2e-2)
    print("KERNEL_OK")
</pallas_src>

<mosaic_0001>
module attributes {stable_mosaic.version = 11 : i64} {
  func.func @_residual_block_kernel(%arg0: i32, %arg1: memref<1x4x128xf32, #tpu.memory_space<vmem>>, %arg2: memref<1x4x128xbf16, #tpu.memory_space<vmem>>, %arg3: memref<1x4x1xf32, #tpu.memory_space<vmem>>, %arg4: memref<3x8x8xbf16, #tpu.memory_space<vmem>>, %arg5: memref<8x1xf32, #tpu.memory_space<vmem>>, %arg6: memref<8x4xbf16, #tpu.memory_space<vmem>>, %arg7: memref<8x1xf32, #tpu.memory_space<vmem>>, %arg8: memref<1x4x128xf32, #tpu.memory_space<vmem>>, %arg9: memref<1x4x128xf32, #tpu.memory_space<vmem>>, %arg10: memref<8x260xbf16, #tpu.memory_space<vmem>>) attributes {dimension_semantics = [#tpu.dimension_semantics<parallel>], iteration_bounds = array<i64: 2>, scalar_prefetch = 0 : i64, scratch_operands = 1 : i64, tpu.core_type = #tpu.core_type<tc>, window_params = [{transform_indices = @transform_0, window_bounds = array<i64: 1, 4, 128>}, {transform_indices = @transform_1, window_bounds = array<i64: 1, 4, 128>}, {transform_indices = @transform_2, window_bounds = array<i64: 1, 4, 1>}, {pipeline_mode = #tpu.pipeline_mode<synchronous>, transform_indices = @transform_3, window_bounds = array<i64: 3, 8, 8>}, {pipeline_mode = #tpu.pipeline_mode<synchronous>, transform_indices = @transform_4, window_bounds = array<i64: 8, 1>}, {pipeline_mode = #tpu.pipeline_mode<synchronous>, transform_indices = @transform_5, window_bounds = array<i64: 8, 4>}, {pipeline_mode = #tpu.pipeline_mode<synchronous>, transform_indices = @transform_6, window_bounds = array<i64: 8, 1>}, {transform_indices = @transform_7, window_bounds = array<i64: 1, 4, 128>}, {transform_indices = @transform_8, window_bounds = array<i64: 1, 4, 128>}]} {
    %cst = arith.constant 0.000000e+00 : bf16
    %0 = vector.broadcast %cst : bf16 to vector<8x2xbf16>
    %c0 = arith.constant 0 : index
    %c0_0 = arith.constant 0 : index
    %1 = vector.load %arg10[%c0, %c0_0] : memref<8x260xbf16, #tpu.memory_space<vmem>>, vector<8x2xbf16>
    tpu.vector_store %arg10[%c0, %c0_0], %0 {strides = array<i32>} : memref<8x260xbf16, #tpu.memory_space<vmem>>, vector<8x2xbf16>,
    %c0_1 = arith.constant 0 : index
    %c130 = arith.constant 130 : index
    %2 = vector.load %arg10[%c0_1, %c130] : memref<8x260xbf16, #tpu.memory_space<vmem>>, vector<8x2xbf16>
    tpu.vector_store %arg10[%c0_1, %c130], %0 {strides = array<i32>} : memref<8x260xbf16, #tpu.memory_space<vmem>>, vector<8x2xbf16>,
    %cst_2 = arith.constant 0.000000e+00 : bf16
    %3 = vector.broadcast %cst_2 : bf16 to vector<8x4xbf16>
    %c0_3 = arith.constant 0 : index
    %c256 = arith.constant 256 : index
    %4 = vector.load %arg10[%c0_3, %c256] : memref<8x260xbf16, #tpu.memory_space<vmem>>, vector<8x4xbf16>
    tpu.vector_store %arg10[%c0_3, %c256], %3 {strides = array<i32>} : memref<8x260xbf16, #tpu.memory_space<vmem>>, vector<8x4xbf16>,
    %5 = tpu.iota {dimensions = array<i32: 1>} : vector<1x128xi32>
    %c16_i32 = arith.constant 16 : i32
    %6 = vector.broadcast %c16_i32 : i32 to vector<1x128xi32>
    %7 = arith.cmpi slt, %5, %6 : vector<1x128xi32>
    %8 = arith.extui %7 : vector<1x128xi1> to vector<1x128xi32>
    %9 = arith.sitofp %8 : vector<1x128xi32> to vector<1x128xf32>
    %c0_4 = arith.constant 0 : index
    %c0_5 = arith.constant 0 : index
    %c0_6 = arith.constant 0 : index
    %10 = vector.load %arg3[%c0_4, %c0_5, %c0_6] : memref<1x4x1xf32, #tpu.memory_space<vmem>>, vector<1x4x1xf32>
    %11 = vector.shape_cast %10 : vector<1x4x1xf32> to vector<4x1xf32>
    %12 = vector.broadcast %11 : vector<4x1xf32> to vector<4x128xf32>
    %13 = vector.broadcast %9 : vector<1x128xf32> to vector<4x128xf32>
    %14 = arith.mulf %12, %13 : vector<4x128xf32>
    %c0_7 = arith.constant 0 : index
    %c0_8 = arith.constant 0 : index
    %c0_9 = arith.constant 0 : index
    %15 = vector.load %arg1[%c0_7, %c0_8, %c0_9] : memref<1x4x128xf32, #tpu.memory_space<vmem>>, vector<1x4x128xf32>
    %16 = vector.shape_cast %15 : vector<1x4x128xf32> to vector<4x128xf32>
    %17 = arith.addf %16, %14 : vector<4x128xf32>
    %18 = arith.truncf %17 : vector<4x128xf32> to vector<4x128xbf16>
    %c0_10 = arith.constant 0 : index
    %c2 = arith.constant 2 : index
    %19 = vector.load %arg10[%c0_10, %c2] : memref<8x260xbf16, #tpu.memory_space<vmem>>, vector<4x128xbf16>
    tpu.vector_store %arg10[%c0_10, %c2], %18 {strides = array<i32>} : memref<8x260xbf16, #tpu.memory_space<vmem>>, vector<4x128xbf16>,
    %c0_11 = arith.constant 0 : index
    %c0_12 = arith.constant 0 : index
    %c0_13 = arith.constant 0 : index
    %20 = vector.load %arg2[%c0_11, %c0_12, %c0_13] : memref<1x4x128xbf16, #tpu.memory_space<vmem>>, vector<1x4x128xbf16>
    %21 = vector.shape_cast %20 : vector<1x4x128xbf16> to vector<4x128xbf16>
    %c4 = arith.constant 4 : index
    %c2_14 = arith.constant 2 : index
    %22 = vector.load %arg10[%c4, %c2_14] : memref<8x260xbf16, #tpu.memory_space<vmem>>, vector<4x128xbf16>
    tpu.vector_store %arg10[%c4, %c2_14], %21 {strides = array<i32>} : memref<8x260xbf16, #tpu.memory_space<vmem>>, vector<4x128xbf16>,
    %c0_15 = arith.constant 0 : index
    %c0_16 = arith.constant 0 : index
    %23 = vector.load %arg5[%c0_15, %c0_16] : memref<8x1xf32, #tpu.memory_space<vmem>>, vector<8x1xf32>
    %24 = vector.shape_cast %23 : vector<8x1xf32> to vector<8x1xf32>
    %25 = vector.broadcast %24 : vector<8x1xf32> to vector<8x256xf32>
    %c0_17 = arith.constant 0 : index
    %c0_18 = arith.constant 0 : index
    %c0_19 = arith.constant 0 : index
    %26 = vector.load %arg4[%c0_17, %c0_18, %c0_19] : memref<3x8x8xbf16, #tpu.memory_space<vmem>>, vector<1x8x8xbf16>
    %27 = vector.shape_cast %26 : vector<1x8x8xbf16> to vector<8x8xbf16>
    %c0_20 = arith.constant 0 : index
    %c0_21 = arith.constant 0 : index
    %28 = vector.load %arg10[%c0_20, %c0_21] : memref<8x260xbf16, #tpu.memory_space<vmem>>, vector<8x256xbf16>
    %cst_22 = arith.constant dense<0.000000e+00> : vector<8x256xf32>
    %29 = tpu.matmul %27, %28, %cst_22 {dimension_numbers = #tpu.dot_dimension_numbers<[1], [0], [0], [1], [0, 0, 1, 1], [], []>} : vector<8x8xbf16>, vector<8x256xbf16>, vector<8x256xf32> -> vector<8x256xf32>
    %30 = arith.addf %25, %29 : vector<8x256xf32>
    %c1 = arith.constant 1 : index
    %c0_23 = arith.constant 0 : index
    %c0_24 = arith.constant 0 : index
    %31 = vector.load %arg4[%c1, %c0_23, %c0_24] : memref<3x8x8xbf16, #tpu.memory_space<vmem>>, vector<1x8x8xbf16>
    %32 = vector.shape_cast %31 : vector<1x8x8xbf16> to vector<8x8xbf16>
    %c0_25 = arith.constant 0 : index
    %c2_26 = arith.constant 2 : index
    %33 = vector.load %arg10[%c0_25, %c2_26] : memref<8x260xbf16, #tpu.memory_space<vmem>>, vector<8x256xbf16>
    %cst_27 = arith.constant dense<0.000000e+00> : vector<8x256xf32>
    %34 = tpu.matmul %32, %33, %cst_27 {dimension_numbers = #tpu.dot_dimension_numbers<[1], [0], [0], [1], [0, 0, 1, 1], [], []>} : vector<8x8xbf16>, vector<8x256xbf16>, vector<8x256xf32> -> vector<8x256xf32>
    %35 = arith.addf %30, %34 : vector<8x256xf32>
    %c2_28 = arith.constant 2 : index
    %c0_29 = arith.constant 0 : index
    %c0_30 = arith.constant 0 : index
    %36 = vector.load %arg4[%c2_28, %c0_29, %c0_30] : memref<3x8x8xbf16, #tpu.memory_space<vmem>>, vector<1x8x8xbf16>
    %37 = vector.shape_cast %36 : vector<1x8x8xbf16> to vector<8x8xbf16>
    %c0_31 = arith.constant 0 : index
    %c4_32 = arith.constant 4 : index
    %38 = vector.load %arg10[%c0_31, %c4_32] : memref<8x260xbf16, #tpu.memory_space<vmem>>, vector<8x256xbf16>
    %cst_33 = arith.constant dense<0.000000e+00> : vector<8x256xf32>
    %39 = tpu.matmul %37, %38, %cst_33 {dimension_numbers = #tpu.dot_dimension_numbers<[1], [0], [0], [1], [0, 0, 1, 1], [], []>} : vector<8x8xbf16>, vector<8x256xbf16>, vector<8x256xf32> -> vector<8x256xf32>
    %40 = arith.addf %35, %39 : vector<8x256xf32>
    %41 = vector.extract_strided_slice %40 {offsets = [0, 0], sizes = [4, 256], strides = [1, 1]} : vector<8x256xf32> to vector<4x256xf32>
    %42 = arith.negf %41 : vector<4x256xf32>
    %43 = math.exp %42 : vector<4x256xf32>
    %cst_34 = arith.constant 1.000000e+00 : f32
    %44 = vector.broadcast %cst_34 : f32 to vector<4x256xf32>
    %45 = arith.addf %44, %43 : vector<4x256xf32>
    %46 = arith.divf %44, %45 : vector<4x256xf32>
    %47 = vector.extract_strided_slice %40 {offsets = [4, 0], sizes = [4, 256], strides = [1, 1]} : vector<8x256xf32> to vector<4x256xf32>
    %48 = math.tanh %47 : vector<4x256xf32>
    %49 = arith.mulf %46, %48 : vector<4x256xf32>
    %c0_35 = arith.constant 0 : index
    %c0_36 = arith.constant 0 : index
    %50 = vector.load %arg6[%c0_35, %c0_36] : memref<8x4xbf16, #tpu.memory_space<vmem>>, vector<8x4xbf16>
    %51 = arith.truncf %49 : vector<4x256xf32> to vector<4x256xbf16>
    %cst_37 = arith.constant dense<0.000000e+00> : vector<8x256xf32>
    %52 = tpu.matmul %50, %51, %cst_37 {dimension_numbers = #tpu.dot_dimension_numbers<[1], [0], [0], [1], [0, 0, 1, 1], [], []>} : vector<8x4xbf16>, vector<4x256xbf16>, vector<8x256xf32> -> vector<8x256xf32>
    %c0_38 = arith.constant 0 : index
    %c0_39 = arith.constant 0 : index
    %53 = vector.load %arg7[%c0_38, %c0_39] : memref<8x1xf32, #tpu.memory_space<vmem>>, vector<8x1xf32>
    %54 = vector.broadcast %53 : vector<8x1xf32> to vector<8x256xf32>
    %55 = arith.addf %52, %54 : vector<8x256xf32>
    %c0_40 = arith.constant 0 : index
    %c0_41 = arith.constant 0 : index
    %c0_42 = arith.constant 0 : index
    %56 = vector.load %arg1[%c0_40, %c0_41, %c0_42] : memref<1x4x128xf32, #tpu.memory_space<vmem>>, vector<1x4x128xf32>
    %57 = vector.shape_cast %56 : vector<1x4x128xf32> to vector<4x128xf32>
    %58 = vector.extract_strided_slice %55 {offsets = [0, 0], sizes = [4, 128], strides = [1, 1]} : vector<8x256xf32> to vector<4x128xf32>
    %59 = arith.addf %57, %58 : vector<4x128xf32>
    %cst_43 = arith.constant 0.707106769 : f32
    %60 = vector.broadcast %cst_43 : f32 to vector<4x128xf32>
    %61 = arith.mulf %59, %60 : vector<4x128xf32>
    %c0_44 = arith.constant 0 : index
    %c0_45 = arith.constant 0 : index
    %c0_46 = arith.constant 0 : index
    %62 = vector.load %arg8[%c0_44, %c0_45, %c0_46] : memref<1x4x128xf32, #tpu.memory_space<vmem>>, vector<1x4x128xf32>
    %63 = vector.shape_cast %62 : vector<1x4x128xf32> to vector<4x128xf32>
    %64 = vector.shape_cast %61 : vector<4x128xf32> to vector<1x4x128xf32>
    tpu.vector_store %arg8[%c0_44, %c0_45, %c0_46], %64 {strides = array<i32>} : memref<1x4x128xf32, #tpu.memory_space<vmem>>, vector<1x4x128xf32>,
    %65 = vector.extract_strided_slice %55 {offsets = [4, 0], sizes = [4, 128], strides = [1, 1]} : vector<8x256xf32> to vector<4x128xf32>
    %c0_47 = arith.constant 0 : index
    %c0_48 = arith.constant 0 : index
    %c0_49 = arith.constant 0 : index
    %66 = vector.load %arg9[%c0_47, %c0_48, %c0_49] : memref<1x4x128xf32, #tpu.memory_space<vmem>>, vector<1x4x128xf32>
    %67 = vector.shape_cast %66 : vector<1x4x128xf32> to vector<4x128xf32>
    %68 = vector.shape_cast %65 : vector<4x128xf32> to vector<1x4x128xf32>
    tpu.vector_store %arg9[%c0_47, %c0_48, %c0_49], %68 {strides = array<i32>} : memref<1x4x128xf32, #tpu.memory_space<vmem>>, vector<1x4x128xf32>,
    return
  }
  func.func @transform_0(%arg0: i32) -> (i32, i32, i32) {
    %c0_i32 = arith.constant 0 : i32
    %c0_i32_0 = arith.constant 0 : i32
    %c0_i32_1 = arith.constant 0 : i32
    return %arg0, %c0_i32, %c0_i32_0 : i32, i32, i32
  }
  func.func @transform_1(%arg0: i32) -> (i32, i32, i32) {
    %c0_i32 = arith.constant 0 : i32
    %c0_i32_0 = arith.constant 0 : i32
    %c0_i32_1 = arith.constant 0 : i32
    return %arg0, %c0_i32, %c0_i32_0 : i32, i32, i32
  }
  func.func @transform_2(%arg0: i32) -> (i32, i32, i32) {
    %c0_i32 = arith.constant 0 : i32
    %c0_i32_0 = arith.constant 0 : i32
    %c0_i32_1 = arith.constant 0 : i32
    return %arg0, %c0_i32, %c0_i32_0 : i32, i32, i32
  }
  func.func @transform_3(%arg0: i32) -> (i32, i32, i32) {
    %c0_i32 = arith.constant 0 : i32
    %c0_i32_0 = arith.constant 0 : i32
    %c0_i32_1 = arith.constant 0 : i32
    %c0_i32_2 = arith.constant 0 : i32
    return %c0_i32, %c0_i32_0, %c0_i32_1 : i32, i32, i32
  }
  func.func @transform_4(%arg0: i32) -> (i32, i32) {
    %c0_i32 = arith.constant 0 : i32
    %c0_i32_0 = arith.constant 0 : i32
    %c0_i32_1 = arith.constant 0 : i32
    return %c0_i32, %c0_i32_0 : i32, i32
  }
  func.func @transform_5(%arg0: i32) -> (i32, i32) {
    %c0_i32 = arith.constant 0 : i32
    %c0_i32_0 = arith.constant 0 : i32
    %c0_i32_1 = arith.constant 0 : i32
    return %c0_i32, %c0_i32_0 : i32, i32
  }
  func.func @transform_6(%arg0: i32) -> (i32, i32) {
    %c0_i32 = arith.constant 0 : i32
    %c0_i32_0 = arith.constant 0 : i32
    %c0_i32_1 = arith.constant 0 : i32
    return %c0_i32, %c0_i32_0 : i32, i32
  }
  func.func @transform_7(%arg0: i32) -> (i32, i32, i32) {
    %c0_i32 = arith.constant 0 : i32
    %c0_i32_0 = arith.constant 0 : i32
    %c0_i32_1 = arith.constant 0 : i32
    return %arg0, %c0_i32, %c0_i32_0 : i32, i32, i32
  }
  func.func @transform_8(%arg0: i32) -> (i32, i32, i32) {
    %c0_i32 = arith.constant 0 : i32
    %c0_i32_0 = arith.constant 0 : i32
    %c0_i32_1 = arith.constant 0 : i32
    return %arg0, %c0_i32, %c0_i32_0 : i32, i32, i32
  }
}

</mosaic_0001>

<bundles_post_ra>
// kernel: tpu_custom_call.1
= control target key start
LH: loop header
LB: loop body
LE: loop exit
PB: predicated region body
PF: predicated region fallthrough
CT: control target
= control target key end

     0   :  { %s1062_s0 = inlined_call_operand.vmem [shape: f32[2,4,128], index: 0, kind: input, shape index: {}]   ;;  %s1063_s1 = inlined_call_operand.vmem [shape: bf16[2,4,128], index: 1, kind: input, shape index: {}]   ;;  %s1064_s2 = inlined_call_operand.vmem [shape: f32[2,4,1], index: 2, kind: input, shape index: {}]   ;;  %s1065_s3 = inlined_call_operand.vmem [shape: bf16[3,8,8], index: 3, kind: input, shape index: {}]   ;;  %s1066_s4 = inlined_call_operand.vmem [shape: f32[8,1], index: 4, kind: input, shape index: {}]   ;;  %s1067_s5 = inlined_call_operand.vmem [shape: bf16[8,4], index: 5, kind: input, shape index: {}]   ;;  %s1068_s6 = inlined_call_operand.vmem [shape: f32[8,1], index: 6, kind: input, shape index: {}]   ;;  %s1069_s7 = inlined_call_operand.hbm [shape: f32[2,4,128], index: 7, kind: output, shape index: {0}]   ;;  %s1070_s8 = inlined_call_operand.hbm [shape: f32[2,4,128], index: 8, kind: output, shape index: {1}]  }
   0x1   :  { %1071 = sst [smem:[#allocation9_spill]] %s1062_s0 }
   0x2   :  { %1072 = sst [smem:[#allocation10_spill]] %s1063_s1 }
   0x3   :  { %1073 = sst [smem:[#allocation11_spill]] %s1064_s2 }
   0x4   :  { %14 = vsyncpa [#allocation4], 0 }
   0x5   :  { %16 = vsyncpa [#allocation4 + $0x1], 0 }
   0x6   :  { %17 = vsyncpa [#allocation6], 0 }
   0x7   :  { %19 = vsyncpa [#allocation6 + $0x1], 0  ;;  %s925_s27 = smov 0   ;;  %s927_s28 = smov 0  }
   0x8   :  { %s929_s29 = smov 0   ;;  %s931_s30 = smov 0  }
   0x9 LB: > { %s946_s9 = sadd.s32 4294967295, %s873_s30   ;;  %s698_s10 = sadd.s32 4294967294, %s873_s30   ;;  %s873_s30 = sphi %s931_s30, %s1082_s30   ;;  %s869_s29 = sphi %s929_s29, %s1081_s29   ;;  %s865_s28 = sphi %s927_s28, %s1080_s28   ;;  %s861_s27 = sphi %s925_s27, %s1079_s27  }
   0xa   : > { %s950_s11 = sadd.s32 1, %s873_s30   ;;  %s194_s12 = sadd.s32 1, %s869_s29 }
   0xb   : > { %s191_s13 = ssub.s32 %s873_s30, %s950_s11  ;;  %p204_p0 = scmp.ne.s32.totalorder %s869_s29, %s865_s28 }
   0xc   : > { %p192_p1 = scmp.eq.s32.totalorder %s191_s13, 0  ;;  %p205_p2 = scmp.eq.s32.totalorder %s946_s9, 1 }
   0xd   : > { %p210_p3 = scmp.ne.s32.totalorder %s865_s28, %s861_s27  ;;  %p211_p4 = scmp.eq.s32.totalorder %s698_s10, 1 }
   0xe   : > { %s961_s14 = scalar_select %p192_p1, %s869_s29, %s194_s12  }
   0xf   : > { %p963_p5 = por %p205_p2, %p204_p0  ;;  %p967_p6 = por %p211_p4, %p210_p3 }
  0x10   : > { %p701_p7 = scmp.ge.s32.totalorder %s873_s30, 1  ;;  %p288_p8 = scmp.lt.s32.totalorder %s873_s30, 3 }
  0x12   : > { %p289_p9 = pnand %p701_p7, %p288_p8 }
  0x13   : > { %p334_p10 = scmp.lt.s32.totalorder (!%p289_p9), %s946_s9, 1  ;;  %s1076_s1 = sld [smem:[#allocation10_spill]] (!%p289_p9) }
  0x14   : > { %292 = sbr.rel (%p289_p9) target bundleno = 721 (0x2d1), region = 48  ;;  %s1077_s2 = sld [smem:[#allocation11_spill]] (!%p289_p9) }
  0x15   : > { %s876_s26 = smov (!%p289_p9), 2   ;;  %s1078_s0 = sld [smem:[#allocation9_spill]] (!%p289_p9) }
  0x16   : > { %s717_s20 = sshll.u32 (!%p289_p9), %s946_s9, 2 }
  0x17   : > { %s577_s24 = scalar_lea.hbm (!%p289_p9), %s1070_s8, %s717_s20 }
  0x18   : > { %s581_s10 = sshll.u32 (!%p289_p9), %s577_s24, 4  ;;  %s582_s10 = int_to_ptr.hbm [resolvable:$true] %s581_s10 }
  0x19   : > { %v875_v0 = vmov 0   ;;  %s335_s17 = scalar_select %p334_p10, %s946_s9, 1  ;;  %vm347_vm0 = vcmask 11264   ;;  %vm349_vm1 = vcmask 27664   ;;  %v353_v4 = vlaneseq  ;;  %v400_v25 = vld [vmem:[%s1065_s3] sm:$0xf] }
  0x1a   : > { %770 = vset.pattern.permute.xlu0 %v875_v0  ;;  %771 = vset.pattern.permute.xlu1 %v875_v0  ;;  %348 = vst.msk [vmem:[#allocation2] sm:$0xf] %vm347_vm0, %v875_v0  ;;  %v877_v6 = vmov 0.0   ;;  %vm390_vm3 = vcmask 1043474   ;;  %vm391_vm4 = vcmask 15366   ;;  %vm372_vm5 = vcmask 15360  }
  0x1b   : > { %772 = vset.pattern.permute.xlu2 %v875_v0  ;;  %s704_s18 = sshll.u32 %s335_s17, 2  ;;  %s705_s19 = sshll.u32 %s335_s17, 1  ;;  %350 = vst.msk [vmem:[#allocation2 + $0x4] sm:$0xf] %vm349_vm1, %v875_v0  ;;  %v354_v5 = vand.u32 127, %v353_v4  ;;  %vm392_vm6 = vmor %vm391_vm4, %vm390_vm3  ;;  %vm375_vm7 = vcmask 1041424  }
  0x1c   : > { %s341_s22 = scalar_lea.vmem %s1076_s1, %s705_s19  ;;  %s345_s25 = scalar_lea.vmem %s1077_s2, %s704_s18  ;;  %vm376_vm8 = vcmask 13316   ;;  %vm409_vm10 = vcmask 1043456   ;;  %vm405_vm11 = vcmask 64512   ;;  %v394_v26 = vld [vmem:[%s1066_s4] sm:$0xff]  ;;  %vm439_vm12 = vcmask 1031168  }
  0x1d   : > { %v358_v1 = vld [vmem:[%s345_s25] sm:$0xf]  ;;  %vm355_vm2 = vcmp.lt.s32.totalorder %v354_v5, 16  ;;  %s984_s13 = scalar_lea.vmem %s1078_s0, %s704_s18  ;;  %vm377_vm9 = vmor %vm376_vm8, %vm375_vm7  ;;  %s878_s17 = smov 126   ;;  %vm467_vm13 = vcmask 1014784   ;;  %vm521_vm3 = vcmask 31744  }
  0x1e   : > { %v379_v2 = vld [vmem:[%s341_s22] sm:$0x3]  ;;  %361 = vperm.xlu0 %770, %v358_v1   ;;  %v707_v7 = vsel %vm355_vm2, 1.0, %v877_v6  ;;  %s879_s18 = smov 124   ;;  %v709_v35 = vld [vmem:[%s1065_s3 + $0x4] sm:$0xf] }
  0x1f   : > { %382 = vst [vmem:[#allocation1 + $0x1] ss:$2 sm:$0xff] %v379_v2  ;;  %v365_v9 = vld [vmem:[%s984_s13] sm:$0xf]  ;;  %v711_v36 = vld [vmem:[%s1065_s3 + $0x8] sm:$0xf] }
  0x20   : > { %v515_v47 = vld [vmem:[%s1068_s6] sm:$0xff]  ;;  %vm525_vm2 = vcmask 1041408   ;;  %s1012_s19 = sand.u32 1, %s865_s28   ;;  %s793_s23 = sshra.s32 %s582_s10, 4  ;;  %s794_s23 = int_to_ptr.hbm [resolvable:$true] %s793_s23 }
  0x21   : > { %v513_v2 = vld [vmem:[%s1067_s5] sm:$0xf]  ;;  %s702_s21 = sshll.u32 %s1012_s19, 2  ;;  %s553_s22 = scalar_lea.sflag [#allocation6], %s1012_s19 }
  0x22   : > { %s333_s25 = scalar_lea.vmem [#allocation5], %s702_s21  ;;  %v542_v5 = vld [vmem:[%s984_s13] sm:$0xf]  ;;  %s326_s9 = scalar_lea.vmem [#allocation3], %s702_s21 }
  0x23   : > { %s795_s2 = scalar_lea.hbm %s794_s23, 4  ;;  %s799_s13 = scalar_lea.hbm %s1070_s8, 8 }
  0x24   : > { %p796_p11 = scmp.ne.s32.totalorder %s794_s23, %s795_s2  ;;  %p800_p0 = scmp.lt.s32.totalorder %s794_s23, %s1070_s8 }
  0x25   : > { %p801_p1 = scmp.lt.s32.totalorder %s799_s13, %s795_s2 }
  0x26   : > { %v383_v3 = vld.sshfl [vmem:[#allocation1] sm:$0xff pattern:$0x75643120]  ;;  %p797_p12 = pnand %p796_p11, %p963_p5 }
  0x27   : > { %385 = vrot.lane.b32.xlu1 %v383_v3, %s876_s26  ;;  %p802_p2 = por %p801_p1, %p800_p0 }
  0x28   : > { %p798_p13 = pneg %p797_p12 }
  0x2a   : > { %p803_p3 = pnand %p802_p2, %p798_p13 }
  0x90   : > { %v362_v8 = vpop.permute.xlu0 %361 }
  0x91   : > { %v364_v10 = vmul.f32 %v707_v7, %v362_v8 }
  0x93   : > { %v366_v11 = vadd.f32 %v365_v9, %v364_v10 }
  0x95   : > { %v367_v12 = vpack.c.bf16 %v366_v11, %v366_v11 }
  0x97   : > { %369 = vrot.lane.b32.xlu0 %v367_v12, %s876_s26  ;;  %s579_s26 = sshll.u32 %s333_s25, 4  ;;  %s580_s26 = int_to_ptr.vmem [resolvable:$true] %s579_s26 }
  0x99   : > { %v386_v13 = vpop.permute.xlu1 %385 }
  0x9a   : > { %v387_v14 = vrot.slane %v386_v13, 4 }
  0x9c   : > { %v388_v15 = vsel %vm372_vm5, %v387_v14, %v386_v13 }
  0x9d   : > { %393 = vst.msk [vmem:[#allocation2] sm:$0xcc] %vm392_vm6, %v388_v15 }
 0x109   : > { %v370_v16 = vpop.permute.xlu0 %369 }
 0x10a   : > { %v371_v17 = vrot.slane %v370_v16, 4 }
 0x10c   : > { %v373_v18 = vsel %vm372_vm5, %v371_v17, %v370_v16 }
 0x10d   : > { %378 = vst.msk [vmem:[#allocation2] sm:$0x33] %vm377_vm9, %v373_v18 }
 0x114   : > { %v429_v19 = vld [vmem:[#allocation2] sm:$0xff] }
 0x115   : > { %v432_v20 = vunpack.c.h.b16 %v429_v19  ;;  %v431_v21 = vunpack.c.l.b16 %v429_v19 }
 0x117   : > { %v434_v22 = vpack.c.b16 %v432_v20, %v432_v20  ;;  %v433_v23 = vpack.c.b16 %v431_v21, %v431_v21 }
 0x119   : > { %437 = vrot.lane.b32.xlu0 %v434_v22, %s878_s17  ;;  %465 = vrot.lane.b32.xlu2 %v434_v22, %s879_s18  ;;  %v411_v24 = vsel %vm409_vm10, %v433_v23, 0 }
 0x11a   : > { %463 = vrot.lane.b32.xlu1 %v433_v23, %s879_s18  ;;  %420 = vmatpush.bf16.msra.mxu0 %v411_v24  ;;  %s565_s18 = sshll.u32 %s326_s9, 4  ;;  %s566_s18 = int_to_ptr.vmem [resolvable:$true] %s565_s18 }
 0x11d   : > { %708 = vmatmul.msk.bf16.vlgmr.msra.gmra.mxu0 %vm405_vm11, %v400_v25 }
 0x121   : > { %435 = vrot.lane.b32.xlu2 %v433_v23, %s878_s17  ;;  %s563_s17 = scalar_lea.hbm %s1069_s7, %s717_s20 }
 0x122   : > { %397 = vperm.xlu1 %771, %v394_v26   ;;  %s567_s1 = sshll.u32 %s563_s17, 4  ;;  %s568_s1 = int_to_ptr.hbm [resolvable:$true] %s567_s1 }
 0x129   : > { %518 = vperm.xlu2 %772, %v515_v47  }
 0x173   : > { %v466_v27 = vpop.permute.xlu2 %465 }
 0x17b   : > { %v436_v28 = vpop.permute.xlu2 %435 }
 0x183   : > { %v519_v3 = vpop.permute.xlu2 %518 }
 0x18b   : > { %v438_v29 = vpop.permute.xlu0 %437 }
 0x18c   : > { %v464_v30 = vpop.permute.xlu1 %463  ;;  %v440_v31 = vsel %vm439_vm12, %v436_v28, %v438_v29 }
 0x18d   : > { %v445_v32 = vsel %vm409_vm10, %v440_v31, 0  ;;  %v468_v33 = vsel %vm467_vm13, %v464_v30, %v466_v27 }
 0x18e   : > { %454 = vmatpush.bf16.msra.mxu1 %v445_v32  ;;  %v473_v34 = vsel %vm409_vm10, %v468_v33, 0 }
 0x18f   : > { %482 = vmatpush.bf16.msra.mxu2 %v473_v34 }
 0x191   : > { %710 = vmatmul.msk.bf16.vlgmr.msra.gmra.mxu1 %vm405_vm11, %v709_v35 }
 0x192   : > { %712 = vmatmul.msk.bf16.vlgmr.msra.gmra.mxu2 %vm405_vm11, %v711_v36 }
 0x194   : > { %v398_v39 = vpop.permute.xlu1 %397 }
 0x19a   : > { %v422_v37 = vpop.f32.mrf.mxu0 }
 0x19b   : > { %v426_v41 = vadd.f32 %v422_v37, %v398_v39 }
 0x1a2   : > { %v424_v38 = vpop.f32.mrf.mxu0 }
 0x20e   : > { %v456_v40 = vpop.f32.mrf.mxu1 }
 0x20f   : > { %v460_v42 = vadd.f32 %v456_v40, %v426_v41 }
 0x215   : > { %v484_v43 = vpop.f32.mrf.mxu2 }
 0x216   : > { %v488_v44 = vadd.f32 %v484_v43, %v460_v42  ;;  %v458_v45 = vpop.f32.mrf.mxu1 }
 0x218   : > { %v713_v46 = vmul.f32 -1.442695, %v488_v44 }
 0x21a   : > { %773 = vpow2.f32 %v713_v46 }
 0x21d   : > { %v486_v48 = vpop.f32.mrf.mxu2 }
 0x220   : > { %v774_v49 = vpop.eup %773 }
 0x221   : > { %v492_v50 = vadd.f32 1.0, %v774_v49 }
 0x223   : > { %775 = vrcp.f32 %v492_v50  ;;  %v504_v54 = vand.u32 2147483648, %v492_v50  ;;  %v502_v56 = vand.u32 2147483647, %v492_v50  ;;  %vm498_vm15 = vweird.f32 %v492_v50 }
 0x224   : > { %777 = vtanh.f32 %v488_v44 }
 0x225   : > { %v505_v59 = vor.u32 1.1754944e-38, %v504_v54  ;;  %vm503_vm1 = vcmp.eq.f32.partialorder %v502_v56, 8.507059e+37 }
 0x229   : > { %v776_v51 = vpop.eup %775 }
 0x22a   : > { %v494_v52 = vmul.f32 %v776_v51, %v492_v50  ;;  %vm499_vm14 = vweird.f32 %v776_v51  ;;  %v778_v57 = vpop.eup %777 }
 0x22b   : > { %vm500_vm0 = vmor %vm498_vm15, %vm499_vm14  ;;  %v510_v61 = vrot.slane %v778_v57, 4 }
 0x22c   : > { %v495_v53 = vsub.f32 1.0, %v494_v52 }
 0x22e   : > { %v496_v55 = vmul.f32 %v776_v51, %v495_v53 }
 0x230   : > { %v497_v58 = vadd.f32 %v776_v51, %v496_v55 }
 0x232   : > { %v501_v60 = vsel %vm500_vm0, %v776_v51, %v497_v58 }
 0x233   : > { %v506_v62 = vsel %vm503_vm1, %v505_v59, %v501_v60 }
 0x234   : > { %v512_v63 = vmul.f32 %v510_v61, %v506_v62 }
 0x236   : > { %v514_v0 = vpack.c.bf16 %v512_v63, %v512_v63 }
 0x238   : > { %v527_v1 = vsel %vm525_vm2, %v514_v0, 0 }
 0x239   : > { %536 = vmatpush.bf16.msra.mxu3 %v527_v1 }
 0x23c   : > { %714 = vmatmul.msk.bf16.vlgmr.msra.gmra.mxu3 %vm521_vm3, %v513_v2 }
 0x2bf   : > { %v538_v4 = vpop.f32.mrf.mxu3 }
 0x2c0   : > { %v539_v6 = vadd.f32 %v538_v4, %v519_v3 }
 0x2c2   : > { %v543_v7 = vadd.f32 %v542_v5, %v539_v6  ;;  %546 = vst [vmem:[%s333_s25 - $0x4] sm:$0xf0] %v539_v6 }
 0x2c3   : > { %806 = shalt.err (!%p803_p3)
}
 0x2c4   : > { %722 = dma.vmem_to_hbm [thread:$0]  (%p963_p5), %s580_s26, 64, %s582_s10, %s553_s22   ;;  %v544_v8 = vmul.f32 0.70710677, %v543_v7 }
 0x2c5   : > { %s548_s21 = scalar_lea.sflag [#allocation4], %s1012_s19  ;;  %s821_s25 = sshra.s32 %s568_s1, 4  ;;  %s822_s25 = int_to_ptr.hbm [resolvable:$true] %s821_s25 }
 0x2c6   : > { %545 = vst [vmem:[%s326_s9] sm:$0xf] %v544_v8  ;;  %s823_s17 = scalar_lea.hbm %s822_s25, 4  ;;  %s827_s0 = scalar_lea.hbm %s1069_s7, 8 }
 0x2c7   : > { %v540_v9 = vpop.f32.mrf.mxu3  ;;  %p824_p4 = scmp.ne.s32.totalorder %s822_s25, %s823_s17  ;;  %p828_p9 = scmp.lt.s32.totalorder %s822_s25, %s1069_s7 }
 0x2c8   : > { %p829_p10 = scmp.lt.s32.totalorder %s827_s0, %s823_s17 }
 0x2c9   : > { %p825_p7 = pnand %p824_p4, %p963_p5 }
 0x2ca   : > { %p830_p11 = por %p829_p10, %p828_p9 }
 0x2cb   : > { %p826_p8 = pneg %p825_p7 }
 0x2cd   : > { %p831_p12 = pnand %p830_p11, %p826_p8 }
 0x2cf   : > { %834 = shalt.err (!%p831_p12)
}
 0x2d0   : > { %721 = dma.vmem_to_hbm [thread:$0]  (%p963_p5), %s566_s18, 64, %s568_s1, %s548_s21  }
 0x2d1 PF: > { %p732_p13 = scmp.ge.s32.totalorder %s873_s30, 2  ;;  %s593_s19 = sand.u32 1, %s861_s27  }
 0x2d2   : > { %s594_s26 = scalar_lea.sflag [#allocation4], %s593_s19 }
 0x2d3   : > { %p726_p0 = pnand %p732_p13, %p967_p6 }
 0x2d5   : > { %p727_p1 = pneg %p726_p0 }
 0x2d7   : > { %852 = dma.done.wait (%p727_p1), %s594_s26, 64  }
 0x2d8   : > { %854 = vsyncadd (%p727_p1), %s594_s26, 4294967232  ;;  %s604_s10 = scalar_lea.sflag [#allocation6], %s593_s19 }
 0x2d9   : > { %856 = dma.done.wait (%p727_p1), %s604_s10, 64  }
 0x2da   : > { %858 = vsyncadd (%p727_p1), %s604_s10, 4294967232  ;;  %p22_p5 = scmp.ge.s32.totalorder %s950_s11, 4   ;;  %s1079_s27 = smov %s865_s28 }
 0x2db   : > { %s1080_s28 = smov %s869_s29  ;;  %s1081_s29 = smov %s961_s14 }
 0x2dc   : > { %s1082_s30 = smov %s950_s11  ;;  %24 = sbr.rel (!%p22_p5) target bundleno = 9 (0x9), region = 109 }
 0x2e1   :  { %610 = vsyncpa [#allocation4], 1 }
 0x2e2   :  { %612 = vsyncpa [#allocation4 + $0x1], 1 }
 0x2e3   :  { %613 = vsyncpa [#allocation6], 1 }
 0x2e4   :  { %615 = vsyncpa [#allocation6 + $0x1], 1 }

</bundles_post_ra>
